<compile_context>
chip_gen: v7x
topology: tpu7x:2x2x1
jax: 0.10.0
libtpu: 0.0.40
codegen_flags: <defaults>
</compile_context>

<pallas_src>
import functools

import numpy as np
import jax
import jax.numpy as jnp
from jax.experimental import pallas as pl
from jax.experimental.pallas import tpu as pltpu

S_SCALE = 30.0                  # `s` from the module
_TINY_C_THRESHOLD = 64          # below this, plain XLA beats kernel overhead
_TARGET_BLOCK_BYTES = 2 << 20   # ~2 MiB x-block -> past per-step-overhead knee


def _round_up(v, m):
    return (v + m - 1) // m * m


def _vmem_capacity_bytes():
    try:
        return int(pltpu.get_tpu_info().vmem_capacity_bytes)
    except Exception:
        return 64 * 1024 * 1024        # conservative: v7x per-TC VMEM


def _pick_tiling(n, c):
    """Choose rows-per-block and an explicit scoped-VMEM limit (per generation)."""
    vmem_cap = _vmem_capacity_bytes()
    budget = int(vmem_cap * 0.6)       # headroom for target/output buffers + scratch

    if n <= 8:
        tile_n = n                     # single block, equal to the full batch dim
    else:
        row_bytes = 4 * c
        tile_n = _round_up(max(8, _TARGET_BLOCK_BYTES // row_bytes), 8)
        tile_n = max(512, min(tile_n, 8192))
        # double-buffered x blocks must fit the budget: 2 * tile_n * row_bytes
        tile_n = min(tile_n, max(8, (budget // (2 * row_bytes)) // 8 * 8))
        n8 = _round_up(n, 8)
        tile_n = min(tile_n, n8)
        # keep >= 2 grid steps so v7x megacore can split the batch axis
        if tile_n >= n8 and n8 > 8:
            tile_n = _round_up(pl.cdiv(n, 2), 8)

    need = 2 * (tile_n * 4 * c + 2 * tile_n * 4) + 2 * (4 * c) + (1 << 20)
    vmem_limit = max(16 << 20, min(need, int(vmem_cap * 0.9)))
    return tile_n, vmem_limit


def _ldam_nll_kernel(x_ref, tgt_ref, m_ref, nll_ref, *, n_rows, tile_n, s):
    """Per-row NLL of the margin-adjusted, s-scaled logits (weight-free)."""
    x = x_ref[...]                                   # (tile_n, C) f32
    tgt = tgt_ref[...]                               # (tile_n, 1) i32
    m = m_ref[...]                                   # (1, C)      f32

    # boolean one-hot via a (1, C) class iota broadcast against (tile_n, 1) targets
    cls = jax.lax.broadcasted_iota(jnp.int32, m.shape, 1)    # (1, C)
    mask = cls == tgt                                         # (tile_n, C) bool

    # output = where(onehot, x - m[target], x) == x - onehot*m ; scaled by s
    logits = s * (x - jnp.where(mask, m, 0.0))

    # numerically stable per-row log-softmax cross entropy
    zmax = jnp.max(logits, axis=1, keepdims=True)
    lse = jnp.log(jnp.sum(jnp.exp(logits - zmax), axis=1, keepdims=True)) + zmax
    tgt_logit = jnp.sum(jnp.where(mask, logits, 0.0), axis=1, keepdims=True)
    nll = lse - tgt_logit                            # (tile_n, 1)

    if n_rows % tile_n != 0:
        # The ragged last block reads OOB garbage rows (no wrapper-side pad);
        # zero them so downstream sums ignore them (their writes are dropped
        # by Pallas anyway, this also kills any NaN/inf intermediates).
        row = (pl.program_id(0) * tile_n
               + jax.lax.broadcasted_iota(jnp.int32, nll.shape, 0))
        nll = jnp.where(row < n_rows, nll, 0.0)
    nll_ref[...] = nll


def _ldam_nll_pallas(x, target, m_list, s):
    """Returns per-row NLL, shape (N,)."""
    n, c = x.shape
    tile_n, vmem_limit = _pick_tiling(n, c)
    grid = (pl.cdiv(n, tile_n),)

    tgt2d = target.reshape(n, 1)
    m2d = m_list.reshape(1, c)

    kernel = functools.partial(_ldam_nll_kernel, n_rows=n, tile_n=tile_n, s=s)
    nll = pl.pallas_call(
        kernel,
        out_shape=jax.ShapeDtypeStruct((n, 1), jnp.float32),
        grid=grid,
        in_specs=[pl.BlockSpec((tile_n, c), lambda i: (i, 0)),
                  pl.BlockSpec((tile_n, 1), lambda i: (i, 0)),
                  pl.BlockSpec((1, c), lambda i: (0, 0))],
        out_specs=pl.BlockSpec((tile_n, 1), lambda i: (i, 0)),
        compiler_params=pltpu.CompilerParams(
            dimension_semantics=("parallel",),
            vmem_limit_bytes=vmem_limit),
    )(x, tgt2d, m2d)
    return nll[:, 0]


def _ldam_xla(x, target, m_list, weight, s):
    """Tiny-C fast path: problem is a few KB, XLA avoids kernel overhead."""
    c = x.shape[1]
    onehot = jax.nn.one_hot(target, c, dtype=x.dtype)
    logits = s * (x - onehot * m_list[None, :])
    logp = jax.nn.log_softmax(logits, axis=1)
    nll = -jnp.take_along_axis(logp, target[:, None], axis=1)[:, 0]
    if weight is None:
        return jnp.mean(nll)
    w_t = weight[target]
    return jnp.sum(w_t * nll) / jnp.sum(w_t)


def ldam_loss(x, target, m_list, weight=None, *, s=S_SCALE,
              tiny_c_threshold=_TINY_C_THRESHOLD):
    """LDAMLoss.forward.

    x: (N, C) f32 logits; target: (N,) int; m_list: (C,) f32;
    weight: (C,) f32 or None (None == right after __init__).
    """
    n, c = x.shape
    x = x.astype(jnp.float32)
    target = target.astype(jnp.int32)
    m_list = m_list.astype(jnp.float32)
    if weight is not None:
        weight = weight.astype(jnp.float32)

    if c <= tiny_c_threshold:
        return _ldam_xla(x, target, m_list, weight, s)

    nll = _ldam_nll_pallas(x, target, m_list, s)       # (N,) per-row NLL
    if weight is None:
        return jnp.sum(nll) / n                        # plain mean
    w_t = weight[target]                               # tiny XLA gather
    return jnp.sum(w_t * nll) / jnp.sum(w_t)           # PyTorch weighted-CE


def _reference_ldam(x, target, m_list, weight=None, s=S_SCALE):
    onehot = jax.nn.one_hot(target, x.shape[1], dtype=jnp.float32)
    batch_m = (onehot * m_list[None, :]).sum(axis=1, keepdims=True)
    out = jnp.where(onehot > 0, x - batch_m, x)
    logp = jax.nn.log_softmax(s * out, axis=1)
    nll = -jnp.sum(onehot * logp, axis=1)
    if weight is None:
        return jnp.mean(nll)
    w_t = weight[target]
    return jnp.sum(w_t * nll) / jnp.sum(w_t)


if __name__ == "__main__":
    def make_m_list(num_class_list, max_m=0.5):
        m = 1.0 / np.sqrt(np.sqrt(np.asarray(num_class_list, dtype=np.float64)))
        m = m * (max_m / np.max(m))
        return jnp.asarray(m, dtype=jnp.float32)

    def make_weight(num_class_list, beta=0.9999):
        eff = 1.0 - np.power(beta, np.asarray(num_class_list, dtype=np.float64))
        w = (1.0 - beta) / eff
        w = w / np.sum(w) * len(num_class_list)
        return jnp.asarray(w, dtype=jnp.float32)

    key = jax.random.PRNGKey(0)

    # --- main Pallas-path test: C=128 classes, ragged batch (N % tile_n != 0)
    C, N = 128, 300
    counts = np.maximum(1.0, 1000.0 * np.power(0.96, np.arange(C)))   # long tail
    m_list = make_m_list(counts)
    k1, k2, key = jax.random.split(key, 3)
    x = jax.random.normal(k1, (N, C), dtype=jnp.float32)
    target = jax.random.randint(k2, (N,), 0, C, dtype=jnp.int32)

    loss = jax.block_until_ready(ldam_loss(x, target, m_list))        # weight=None
    ref = _reference_ldam(x, target, m_list)
    assert np.allclose(np.asarray(loss), np.asarray(ref), rtol=1e-5, atol=1e-5), (
        float(loss), float(ref))

    # weighted path (after reset_epoch, beta=0.9999): same kernel + XLA gather
    w = make_weight(counts)
    loss_w = jax.block_until_ready(ldam_loss(x, target, m_list, weight=w))
    ref_w = _reference_ldam(x, target, m_list, weight=w)
    assert np.allclose(np.asarray(loss_w), np.asarray(ref_w), rtol=1e-5, atol=1e-5), (
        float(loss_w), float(ref_w))

    # --- tiny-C case (C=10, as in CIFAR-10-LT): default XLA fast path ...
    counts10 = np.array([100, 60, 40, 25, 15, 10, 6, 4, 2, 1], dtype=np.float64)
    m10 = make_m_list(counts10)
    k3, k4, key = jax.random.split(key, 3)
    x10 = jax.random.normal(k3, (13, 10), dtype=jnp.float32)
    t10 = jax.random.randint(k4, (13,), 0, 10, dtype=jnp.int32)

    loss10 = jax.block_until_ready(ldam_loss(x10, t10, m10))
    ref10 = _reference_ldam(x10, t10, m10)
    assert np.allclose(np.asarray(loss10), np.asarray(ref10), rtol=1e-5, atol=1e-5)

    # ... and force the Pallas kernel on the same tiny problem (exercises the
    # ragged last block and small-C lane layout).
    loss10_k = jax.block_until_ready(ldam_loss(x10, t10, m10, tiny_c_threshold=0))
    assert np.allclose(np.asarray(loss10_k), np.asarray(ref10), rtol=1e-5, atol=1e-5)

    print("KERNEL_OK")
</pallas_src>

<mosaic_0001>
module attributes {stable_mosaic.version = 11 : i64} {
  func.func @_ldam_nll_kernel(%arg0: i32, %arg1: memref<152x128xf32, #tpu.memory_space<vmem>>, %arg2: memref<152x1xi32, #tpu.memory_space<vmem>>, %arg3: memref<1x128xf32, #tpu.memory_space<vmem>>, %arg4: memref<152x1xf32, #tpu.memory_space<vmem>>) attributes {dimension_semantics = [#tpu.dimension_semantics<parallel>], iteration_bounds = array<i64: 2>, scalar_prefetch = 0 : i64, scratch_operands = 0 : i64, tpu.core_type = #tpu.core_type<tc>, window_params = [{transform_indices = @transform_0, window_bounds = array<i64: 152, 128>}, {transform_indices = @transform_1, window_bounds = array<i64: 152, 1>}, {pipeline_mode = #tpu.pipeline_mode<synchronous>, transform_indices = @transform_2, window_bounds = array<i64: 1, 128>}, {transform_indices = @transform_3, window_bounds = array<i64: 152, 1>}]} {
    %c0 = arith.constant 0 : index
    %c0_0 = arith.constant 0 : index
    %0 = vector.load %arg1[%c0, %c0_0] : memref<152x128xf32, #tpu.memory_space<vmem>>, vector<152x128xf32>
    %c0_1 = arith.constant 0 : index
    %c0_2 = arith.constant 0 : index
    %1 = vector.load %arg2[%c0_1, %c0_2] : memref<152x1xi32, #tpu.memory_space<vmem>>, vector<152x1xi32>
    %c0_3 = arith.constant 0 : index
    %c0_4 = arith.constant 0 : index
    %2 = vector.load %arg3[%c0_3, %c0_4] : memref<1x128xf32, #tpu.memory_space<vmem>>, vector<1x128xf32>
    %3 = tpu.iota {dimensions = array<i32: 1>} : vector<1x128xi32>
    %4 = vector.broadcast %3 : vector<1x128xi32> to vector<152x128xi32>
    %5 = vector.broadcast %1 : vector<152x1xi32> to vector<152x128xi32>
    %6 = arith.cmpi eq, %4, %5 : vector<152x128xi32>
    %cst = arith.constant 0.000000e+00 : f32
    %7 = vector.shape_cast %2 : vector<1x128xf32> to vector<1x128xf32>
    %8 = vector.broadcast %7 : vector<1x128xf32> to vector<152x128xf32>
    %9 = vector.broadcast %cst : f32 to vector<152x128xf32>
    %10 = arith.select %6, %8, %9 : vector<152x128xi1>, vector<152x128xf32>
    %11 = arith.subf %0, %10 : vector<152x128xf32>
    %cst_5 = arith.constant 3.000000e+01 : f32
    %12 = vector.broadcast %cst_5 : f32 to vector<152x128xf32>
    %13 = arith.mulf %12, %11 : vector<152x128xf32>
    %cst_6 = arith.constant dense<0xFF800000> : vector<152xf32>
    %14 = vector.multi_reduction <maximumf>, %13, %cst_6 [1] : vector<152x128xf32> to vector<152xf32>
    %15 = vector.shape_cast %14 : vector<152xf32> to vector<152x1xf32>
    %16 = vector.broadcast %15 : vector<152x1xf32> to vector<152x128xf32>
    %17 = arith.subf %13, %16 : vector<152x128xf32>
    %18 = math.exp %17 : vector<152x128xf32>
    %cst_7 = arith.constant dense<0.000000e+00> : vector<152xf32>
    %19 = vector.multi_reduction <add>, %18, %cst_7 [1] : vector<152x128xf32> to vector<152xf32>
    %20 = vector.shape_cast %19 : vector<152xf32> to vector<152x1xf32>
    %21 = math.log %20 : vector<152x1xf32>
    %22 = arith.addf %21, %15 : vector<152x1xf32>
    %cst_8 = arith.constant 0.000000e+00 : f32
    %23 = vector.broadcast %cst_8 : f32 to vector<152x128xf32>
    %24 = arith.select %6, %13, %23 : vector<152x128xi1>, vector<152x128xf32>
    %cst_9 = arith.constant dense<0.000000e+00> : vector<152xf32>
    %25 = vector.multi_reduction <add>, %24, %cst_9 [1] : vector<152x128xf32> to vector<152xf32>
    %26 = vector.shape_cast %25 : vector<152xf32> to vector<152x1xf32>
    %27 = arith.subf %22, %26 : vector<152x1xf32>
    %c152_i32 = arith.constant 152 : i32
    %28 = arith.muli %arg0, %c152_i32 : i32
    %29 = tpu.iota {dimensions = array<i32: 0>} : vector<152x1xi32>
    %30 = vector.broadcast %28 : i32 to vector<152x1xi32>
    %31 = arith.addi %30, %29 : vector<152x1xi32>
    %c300_i32 = arith.constant 300 : i32
    %32 = vector.broadcast %c300_i32 : i32 to vector<152x1xi32>
    %33 = arith.cmpi slt, %31, %32 : vector<152x1xi32>
    %cst_10 = arith.constant 0.000000e+00 : f32
    %34 = vector.broadcast %cst_10 : f32 to vector<152x1xf32>
    %35 = arith.select %33, %27, %34 : vector<152x1xi1>, vector<152x1xf32>
    %c0_11 = arith.constant 0 : index
    %c0_12 = arith.constant 0 : index
    %36 = vector.load %arg4[%c0_11, %c0_12] : memref<152x1xf32, #tpu.memory_space<vmem>>, vector<152x1xf32>
    tpu.vector_store %arg4[%c0_11, %c0_12], %35 {strides = array<i32>} : memref<152x1xf32, #tpu.memory_space<vmem>>, vector<152x1xf32>,
    return
  }
  func.func @transform_0(%arg0: i32) -> (i32, i32) {
    %c0_i32 = arith.constant 0 : i32
    %c0_i32_0 = arith.constant 0 : i32
    return %arg0, %c0_i32 : i32, i32
  }
  func.func @transform_1(%arg0: i32) -> (i32, i32) {
    %c0_i32 = arith.constant 0 : i32
    %c0_i32_0 = arith.constant 0 : i32
    return %arg0, %c0_i32 : i32, i32
  }
  func.func @transform_2(%arg0: i32) -> (i32, i32) {
    %c0_i32 = arith.constant 0 : i32
    %c0_i32_0 = arith.constant 0 : i32
    %c0_i32_1 = arith.constant 0 : i32
    return %c0_i32, %c0_i32_0 : i32, i32
  }
  func.func @transform_3(%arg0: i32) -> (i32, i32) {
    %c0_i32 = arith.constant 0 : i32
    %c0_i32_0 = arith.constant 0 : i32
    return %arg0, %c0_i32 : i32, i32
  }
}

</mosaic_0001>

<bundles_post_ra>
// kernel: tpu_custom_call.1
= control target key start
LH: loop header
LB: loop body
LE: loop exit
PB: predicated region body
PF: predicated region fallthrough
CT: control target
= control target key end

     0   :  { %s936_s12 = smov 0   ;;  %s1510_s0 = inlined_call_operand.vmem [shape: f32[300,128], index: 0, kind: input, shape index: {}]   ;;  %s1511_s1 = inlined_call_operand.vmem [shape: s32[300,1], index: 1, kind: input, shape index: {}]   ;;  %s1512_s2 = inlined_call_operand.vmem [shape: f32[1,128], index: 2, kind: input, shape index: {}]   ;;  %s1513_s3 = inlined_call_operand.vmem [shape: f32[300,1], index: 3, kind: output, shape index: {}]  }
   0x1 LB: > { %s809_s13 = sadd.s32 4294967295, %s913_s12   ;;  %p813_p0 = scmp.ge.s32.totalorder %s913_s12, 1  ;;  %s913_s12 = sphi %s936_s12, %s13_s12  }
   0x2   : > { %p149_p1 = scmp.lt.s32.totalorder %s913_s12, 3 }
   0x4   : > { %p150_p2 = pnand %p813_p0, %p149_p1 }
   0x5   : > { %s178_s14 = smul.u32 (!%p150_p2), 19, %s809_s13  ;;  %v915_v0 = vmov (!%p150_p2), 0   ;;  %v235_v20 = vlaneseq (!%p150_p2)  ;;  %v985_v22 = vld [vmem:[%s1512_s2] ss:$0 sm:$0xff] (!%p150_p2) }
   0x6   : > { %153 = sbr.rel (%p150_p2) target bundleno = 510 (0x1fe), region = 32  ;;  %830 = vset.pattern.permute.xlu1 (!%p150_p2), %v915_v0  ;;  %829 = vset.pattern.permute.xlu0 (!%p150_p2), %v915_v0 }
   0x7   : > { %p179_p3 = scmp.lt.s32.totalorder (!%p150_p2), %s178_s14, 37  ;;  %v974_v21 = vand.u32 (!%p150_p2), 127, %v235_v20  ;;  %s642_s24 = smul.u32 (!%p150_p2), 152, %s809_s13 }
   0xd   : > { %s1521_s14 = smov (!%p179_p3, %s178_s14), 37 }
   0xe   : > { %s946_s15 = sshll.u32 %s1521_s14, 3 }
   0xf   : > { %s952_s18 = scalar_lea.vmem %s1511_s1, %s946_s15  ;;  %s980_s21 = scalar_lea.vmem %s1510_s0, %s946_s15 }
  0x10   : > { %v217_v1 = vld [vmem:[%s952_s18 + $0x10] sm:$0xff]  ;;  %v215_v2 = vld [vmem:[%s952_s18] sm:$0xff]  ;;  %v218_v3 = vld [vmem:[%s952_s18 + $0x18] sm:$0xff]  ;;  %s1402_s27 = scalar_lea.vmem %s1513_s3, %s946_s15 }
  0x11   : > { %244 = vperm.xlu1 %830, %v217_v1   ;;  %238 = vperm.xlu0 %829, %v215_v2   ;;  %v216_v4 = vld [vmem:[%s952_s18 + $0x8] sm:$0xff]  ;;  %v219_v6 = vld [vmem:[%s952_s18 + $0x20] sm:$0xff]  ;;  %v222_v7 = vld [vmem:[%s952_s18 + $0x38] sm:$0xff] }
  0x12   : > { %v220_v5 = vld [vmem:[%s952_s18 + $0x28] sm:$0xff]  ;;  %v221_v8 = vld [vmem:[%s952_s18 + $0x30] sm:$0xff]  ;;  %v223_v10 = vld [vmem:[%s952_s18 + $0x40] sm:$0xff] }
  0x13   : > { %v224_v9 = vld [vmem:[%s952_s18 + $0x48] sm:$0xff]  ;;  %v226_v11 = vld [vmem:[%s952_s18 + $0x58] sm:$0xff]  ;;  %v225_v12 = vld [vmem:[%s952_s18 + $0x50] sm:$0xff] }
  0x14   : > { %v228_v13 = vld [vmem:[%s952_s18 + $0x68] sm:$0xff]  ;;  %v227_v14 = vld [vmem:[%s952_s18 + $0x60] sm:$0xff]  ;;  %v230_v15 = vld [vmem:[%s952_s18 + $0x78] sm:$0xff] }
  0x15   : > { %247 = vperm.xlu1 %830, %v218_v3   ;;  %241 = vperm.xlu0 %829, %v216_v4   ;;  %v229_v16 = vld [vmem:[%s952_s18 + $0x70] sm:$0xff]  ;;  %v232_v17 = vld [vmem:[%s952_s18 + $0x88] sm:$0xff]  ;;  %v231_v18 = vld [vmem:[%s952_s18 + $0x80] sm:$0xff] }
  0x16   : > { %v233_v19 = vld [vmem:[%s952_s18 + $0x90] sm:$0xff]  ;;  %v196_v25 = vld [vmem:[%s980_s21] sm:$0xff]  ;;  %v199_v29 = vld [vmem:[%s980_s21 + $0x18] sm:$0xff] }
  0x17   : > { %v197_v31 = vld [vmem:[%s980_s21 + $0x8] sm:$0xff]  ;;  %v198_v32 = vld [vmem:[%s980_s21 + $0x10] sm:$0xff]  ;;  %v200_v45 = vld [vmem:[%s980_s21 + $0x20] sm:$0xff] }
  0x18   : > { %v201_v41 = vld [vmem:[%s980_s21 + $0x28] sm:$0xff]  ;;  %v203_v51 = vld [vmem:[%s980_s21 + $0x38] sm:$0xff]  ;;  %v202_v56 = vld [vmem:[%s980_s21 + $0x30] sm:$0xff] }
  0x19   : > { %253 = vperm.xlu1 %830, %v220_v5   ;;  %250 = vperm.xlu0 %829, %v219_v6   ;;  %v205_v61 = vld [vmem:[%s980_s21 + $0x48] sm:$0xff]  ;;  %v204_v1 = vld [vmem:[%s980_s21 + $0x40] sm:$0xff] }
  0x1d   : > { %259 = vperm.xlu1 %830, %v222_v7   ;;  %256 = vperm.xlu0 %829, %v221_v8   ;;  %v207_v7 = vld [vmem:[%s980_s21 + $0x58] sm:$0xff] }
  0x21   : > { %265 = vperm.xlu1 %830, %v224_v9   ;;  %262 = vperm.xlu0 %829, %v223_v10  }
  0x25   : > { %271 = vperm.xlu1 %830, %v226_v11   ;;  %268 = vperm.xlu0 %829, %v225_v12   ;;  %v206_v12 = vld [vmem:[%s980_s21 + $0x50] sm:$0xff] }
  0x29   : > { %277 = vperm.xlu1 %830, %v228_v13   ;;  %274 = vperm.xlu0 %829, %v227_v14  }
  0x2d   : > { %283 = vperm.xlu1 %830, %v230_v15   ;;  %280 = vperm.xlu0 %829, %v229_v16  }
  0x31   : > { %289 = vperm.xlu1 %830, %v232_v17   ;;  %286 = vperm.xlu0 %829, %v231_v18   ;;  %v209_v17 = vld [vmem:[%s980_s21 + $0x68] sm:$0xff] }
  0x35   : > { %292 = vperm.xlu0 %829, %v233_v19  }
  0x90   : > { %v987_v23 = vpop.permute.xlu1 %244  ;;  %v989_v24 = vpop.permute.xlu0 %238 }
  0x91   : > { %vm294_vm0 = vcmp.eq.s32.totalorder %v974_v21, %v989_v24  ;;  %vm296_vm1 = vcmp.eq.s32.totalorder %v974_v21, %v987_v23 }
  0x92   : > { %v319_v26 = vsel %vm294_vm0, %v985_v22, 0.0  ;;  %v321_v33 = vsel %vm296_vm1, %v985_v22, 0.0 }
  0x93   : > { %v338_v27 = vsub.f32 %v196_v25, %v319_v26  ;;  %v340_v39 = vsub.f32 %v198_v32, %v321_v33  ;;  %v208_v26 = vld [vmem:[%s980_s21 + $0x60] sm:$0xff] }
  0x94   : > { %v1000_v28 = vpop.permute.xlu1 %247  ;;  %v1003_v30 = vpop.permute.xlu0 %241 }
  0x95   : > { %v1011_v34 = vmul.f32 30.0, %v338_v27  ;;  %vm297_vm2 = vcmp.eq.s32.totalorder %v974_v21, %v1000_v28  ;;  %vm295_vm3 = vcmp.eq.s32.totalorder %v974_v21, %v1003_v30  ;;  %v1055_v53 = vmul.f32 30.0, %v340_v39 }
  0x96   : > { %v322_v35 = vsel %vm297_vm2, %v985_v22, 0.0  ;;  %v320_v36 = vsel %vm295_vm3, %v985_v22, 0.0 }
  0x97   : > { %v341_v37 = vsub.f32 %v199_v29, %v322_v35  ;;  %v339_v38 = vsub.f32 %v197_v31, %v320_v36  ;;  %376 = vmax.xlane.f32.xlu1 %v1011_v34  ;;  %v211_v35 = vld [vmem:[%s980_s21 + $0x78] sm:$0xff]  ;;  %v566_v30 = vsel %vm294_vm0, %v1011_v34, 0.0 }
  0x98   : > { %v1026_v40 = vpop.permute.xlu1 %253  ;;  %v1029_v42 = vpop.permute.xlu0 %250 }
  0x99   : > { %v1031_v43 = vmul.f32 30.0, %v341_v37  ;;  %v1033_v44 = vmul.f32 30.0, %v339_v38  ;;  %vm299_vm4 = vcmp.eq.s32.totalorder %v974_v21, %v1026_v40  ;;  %vm298_vm5 = vcmp.eq.s32.totalorder %v974_v21, %v1029_v42 }
  0x9a   : > { %v324_v46 = vsel %vm299_vm4, %v985_v22, 0.0  ;;  %v323_v47 = vsel %vm298_vm5, %v985_v22, 0.0 }
  0x9b   : > { %v343_v48 = vsub.f32 %v201_v41, %v324_v46  ;;  %378 = vmax.xlane.f32.xlu0 %v1033_v44  ;;  %382 = vmax.xlane.f32.xlu1 %v1031_v43  ;;  %v342_v49 = vsub.f32 %v200_v45, %v323_v47  ;;  %v210_v41 = vld [vmem:[%s980_s21 + $0x70] sm:$0xff] }
  0x9c   : > { %v1050_v50 = vpop.permute.xlu1 %259  ;;  %v1053_v52 = vpop.permute.xlu0 %256 }
  0x9d   : > { %v1057_v54 = vmul.f32 30.0, %v343_v48  ;;  %vm301_vm6 = vcmp.eq.s32.totalorder %v974_v21, %v1050_v50  ;;  %vm300_vm7 = vcmp.eq.s32.totalorder %v974_v21, %v1053_v52  ;;  %v1074_v59 = vmul.f32 30.0, %v342_v49  ;;  %v213_v49 = vld [vmem:[%s980_s21 + $0x88] sm:$0xff] }
  0x9e   : > { %v326_v55 = vsel %vm301_vm6, %v985_v22, 0.0  ;;  %v325_v57 = vsel %vm300_vm7, %v985_v22, 0.0 }
  0x9f   : > { %v345_v58 = vsub.f32 %v203_v51, %v326_v55  ;;  %380 = vmax.xlane.f32.xlu0 %v1055_v53  ;;  %386 = vmax.xlane.f32.xlu1 %v1057_v54  ;;  %v344_v0 = vsub.f32 %v202_v56, %v325_v57  ;;  %v570_v40 = vsel %vm298_vm5, %v1074_v59, 0.0 }
  0xa0   : > { %v1076_v60 = vpop.permute.xlu1 %265  ;;  %v1079_v62 = vpop.permute.xlu0 %262 }
  0xa1   : > { %v1081_v63 = vmul.f32 30.0, %v345_v58  ;;  %vm303_vm8 = vcmp.eq.s32.totalorder %v974_v21, %v1076_v60  ;;  %vm302_vm9 = vcmp.eq.s32.totalorder %v974_v21, %v1079_v62  ;;  %v1103_v9 = vmul.f32 30.0, %v344_v0  ;;  %v212_v58 = vld [vmem:[%s980_s21 + $0x80] sm:$0xff] }
  0xa2   : > { %v328_v2 = vsel %vm303_vm8, %v985_v22, 0.0  ;;  %v327_v3 = vsel %vm302_vm9, %v985_v22, 0.0 }
  0xa3   : > { %v347_v4 = vsub.f32 %v205_v61, %v328_v2  ;;  %384 = vmax.xlane.f32.xlu0 %v1074_v59  ;;  %390 = vmax.xlane.f32.xlu1 %v1081_v63  ;;  %v346_v5 = vsub.f32 %v204_v1, %v327_v3  ;;  %v573_v28 = vsel %vm301_vm6, %v1081_v63, 0.0  ;;  %v572_v23 = vsel %vm300_vm7, %v1103_v9, 0.0 }
  0xa4   : > { %v1098_v6 = vpop.permute.xlu1 %271  ;;  %v1101_v8 = vpop.permute.xlu0 %268 }
  0xa5   : > { %v1105_v10 = vmul.f32 30.0, %v347_v4  ;;  %vm305_vm10 = vcmp.eq.s32.totalorder %v974_v21, %v1098_v6  ;;  %vm304_vm11 = vcmp.eq.s32.totalorder %v974_v21, %v1101_v8  ;;  %v1122_v15 = vmul.f32 30.0, %v346_v5  ;;  %v214_v5 = vld [vmem:[%s980_s21 + $0x90] sm:$0xff] }
  0xa6   : > { %v330_v11 = vsel %vm305_vm10, %v985_v22, 0.0  ;;  %v329_v13 = vsel %vm304_vm11, %v985_v22, 0.0 }
  0xa7   : > { %v349_v14 = vsub.f32 %v207_v7, %v330_v11  ;;  %388 = vmax.xlane.f32.xlu0 %v1103_v9  ;;  %394 = vmax.xlane.f32.xlu1 %v1105_v10  ;;  %v348_v25 = vsub.f32 %v206_v12, %v329_v13  ;;  %v567_v13 = vsel %vm295_vm3, %v1033_v44, 0.0  ;;  %v575_v24 = vsel %vm303_vm8, %v1105_v10, 0.0 }
  0xa8   : > { %v1124_v16 = vpop.permute.xlu1 %277  ;;  %v1127_v18 = vpop.permute.xlu0 %274  ;;  %v574_v50 = vsel %vm302_vm9, %v1122_v15, 0.0 }
  0xa9   : > { %v1129_v19 = vmul.f32 30.0, %v349_v14  ;;  %vm1515_vm12 = vcmp.eq.s32.totalorder %v974_v21, %v1124_v16  ;;  %vm306_vm13 = vcmp.eq.s32.totalorder %v974_v21, %v1127_v18  ;;  %v1151_v37 = vmul.f32 30.0, %v348_v25 }
  0xaa   : > { %v332_v27 = vsel %vm1515_vm12, %v985_v22, 0.0  ;;  %v331_v29 = vsel %vm306_vm13, %v985_v22, 0.0  ;;  %v568_v25 = vsel %vm296_vm1, %v1055_v53, 0.0  ;;  %vm1517_vm0 = vcmp.eq.s32.totalorder %v974_v21, %v1124_v16 }
  0xab   : > { %v351_v31 = vsub.f32 %v209_v17, %v332_v27  ;;  %392 = vmax.xlane.f32.xlu0 %v1122_v15  ;;  %398 = vmax.xlane.f32.xlu1 %v1129_v19  ;;  %v350_v32 = vsub.f32 %v208_v26, %v331_v29  ;;  %v571_v17 = vsel %vm299_vm4, %v1057_v54, 0.0  ;;  %v576_v42 = vsel %vm304_vm11, %v1151_v37, 0.0 }
  0xac   : > { %v1146_v33 = vpop.permute.xlu1 %283  ;;  %v1149_v36 = vpop.permute.xlu0 %280  ;;  %vm721_vm4 = vcmask 7168  }
  0xad   : > { %v1153_v38 = vmul.f32 30.0, %v351_v31  ;;  %vm1514_vm14 = vcmp.eq.s32.totalorder %v974_v21, %v1146_v33  ;;  %vm308_vm15 = vcmp.eq.s32.totalorder %v974_v21, %v1149_v36  ;;  %v1170_v47 = vmul.f32 30.0, %v350_v32 }
  0xae   : > { %v334_v39 = vsel %vm1514_vm14, %v985_v22, 0.0  ;;  %v333_v45 = vsel %vm308_vm15, %v985_v22, 0.0  ;;  %vm1518_vm1 = vcmp.eq.s32.totalorder %v974_v21, %v1146_v33 }
  0xaf   : > { %v353_v46 = vsub.f32 %v211_v35, %v334_v39  ;;  %396 = vmax.xlane.f32.xlu0 %v1151_v37  ;;  %402 = vmax.xlane.f32.xlu1 %v1153_v38  ;;  %v352_v56 = vsub.f32 %v210_v41, %v333_v45  ;;  %v579_v18 = vsel %vm1517_vm0, %v1153_v38, 0.0 }
  0xb0   : > { %v1172_v48 = vpop.permute.xlu1 %289  ;;  %v1175_v51 = vpop.permute.xlu0 %286 }
  0xb1   : > { %v1177_v55 = vmul.f32 30.0, %v353_v46  ;;  %vm1516_vm14 = vcmp.eq.s32.totalorder %v974_v21, %v1172_v48  ;;  %vm310_vm12 = vcmp.eq.s32.totalorder %v974_v21, %v1175_v51  ;;  %v1196_v2 = vmul.f32 30.0, %v352_v56 }
  0xb2   : > { %v336_v57 = vsel %vm1516_vm14, %v985_v22, 0.0  ;;  %v335_v61 = vsel %vm310_vm12, %v985_v22, 0.0 }
  0xb3   : > { %v355_v0 = vsub.f32 %v213_v49, %v336_v57  ;;  %400 = vmax.xlane.f32.xlu0 %v1170_v47  ;;  %406 = vmax.xlane.f32.xlu1 %v1177_v55  ;;  %v354_v4 = vsub.f32 %v212_v58, %v335_v61  ;;  %v581_v6 = vsel %vm1518_vm1, %v1177_v55, 0.0 }
  0xb4   : > { %v1194_v1 = vpop.permute.xlu0 %292 }
  0xb5   : > { %v1198_v3 = vmul.f32 30.0, %v355_v0  ;;  %vm312_vm14 = vcmp.eq.s32.totalorder %v974_v21, %v1194_v1  ;;  %v1209_v11 = vmul.f32 30.0, %v354_v4 }
  0xb6   : > { %v337_v7 = vsel %vm312_vm14, %v985_v22, 0.0  ;;  %v569_v22 = vsel %vm297_vm2, %v1031_v43, 0.0  ;;  %vm1519_vm2 = vcmp.eq.s32.totalorder %v974_v21, %v1172_v48 }
  0xb7   : > { %404 = vmax.xlane.f32.xlu0 %v1196_v2  ;;  %410 = vmax.xlane.f32.xlu1 %v1198_v3  ;;  %v356_v12 = vsub.f32 %v214_v5, %v337_v7  ;;  %v583_v16 = vsel %vm1519_vm2, %v1198_v3, 0.0 }
  0xb9   : > { %v1216_v14 = vmul.f32 30.0, %v356_v12 }
  0xbb   : > { %408 = vmax.xlane.f32.xlu0 %v1209_v11  ;;  %587 = vadd.xlane.f32.xlu1 %v567_v13 }
  0xbf   : > { %412 = vmax.xlane.f32.xlu0 %v1216_v14  ;;  %591 = vadd.xlane.f32.xlu1 %v569_v22 }
  0xc3   : > { %595 = vadd.xlane.f32.xlu1 %v571_v17  ;;  %585 = vadd.xlane.f32.xlu0 %v566_v30 }
  0xc7   : > { %599 = vadd.xlane.f32.xlu1 %v573_v28  ;;  %589 = vadd.xlane.f32.xlu0 %v568_v25 }
  0xcb   : > { %603 = vadd.xlane.f32.xlu1 %v575_v24  ;;  %593 = vadd.xlane.f32.xlu0 %v570_v40 }
  0xcf   : > { %597 = vadd.xlane.f32.xlu0 %v572_v23 }
  0xd3   : > { %601 = vadd.xlane.f32.xlu0 %v574_v50 }
  0xd7   : > { %605 = vadd.xlane.f32.xlu0 %v576_v42 }
 0x124   : > { %v1259_v60 = vpop.xlane.xlu1 %376 }
 0x125   : > { %v414_v26 = vsub.f32 %v1011_v34, %v1259_v60 }
 0x127   : > { %v433_v52 = vmul.f32 1.442695, %v414_v26 }
 0x128   : > { %v1263_v27 = vpop.xlane.xlu0 %378  ;;  %v1265_v29 = vpop.xlane.xlu1 %382 }
 0x129   : > { %831 = vpow2.f32 %v433_v52  ;;  %v415_v62 = vsub.f32 %v1033_v44, %v1263_v27  ;;  %v417_v31 = vsub.f32 %v1031_v43, %v1265_v29 }
 0x12b   : > { %v435_v8 = vmul.f32 1.442695, %v415_v62  ;;  %v439_v32 = vmul.f32 1.442695, %v417_v31 }
 0x12c   : > { %v1271_v35 = vpop.xlane.xlu0 %380  ;;  %v1273_v39 = vpop.xlane.xlu1 %386 }
 0x12d   : > { %833 = vpow2.f32 %v435_v8  ;;  %v416_v34 = vsub.f32 %v1055_v53, %v1271_v35  ;;  %v419_v41 = vsub.f32 %v1057_v54, %v1273_v39 }
 0x12e   : > { %835 = vpow2.f32 %v439_v32 }
 0x12f   : > { %v437_v45 = vmul.f32 1.442695, %v416_v34  ;;  %v443_v46 = vmul.f32 1.442695, %v419_v41 }
 0x130   : > { %v1279_v44 = vpop.xlane.xlu0 %384  ;;  %v1281_v49 = vpop.xlane.xlu1 %390 }
 0x131   : > { %837 = vpow2.f32 %v437_v45  ;;  %v418_v43 = vsub.f32 %v1074_v59, %v1279_v44  ;;  %v421_v56 = vsub.f32 %v1081_v63, %v1281_v49 }
 0x132   : > { %839 = vpow2.f32 %v443_v46 }
 0x133   : > { %v832_v57 = vpop.eup %831  ;;  %v441_v58 = vmul.f32 1.442695, %v418_v43  ;;  %v447_v53 = vmul.f32 1.442695, %v421_v56 }
 0x134   : > { %v1287_v61 = vpop.xlane.xlu0 %388  ;;  %471 = vadd.xlane.f32.xlu1 %v832_v57  ;;  %v1289_v54 = vpop.xlane.xlu1 %394 }
 0x135   : > { %841 = vpow2.f32 %v441_v58  ;;  %v420_v0 = vsub.f32 %v1103_v9, %v1287_v61  ;;  %v423_v4 = vsub.f32 %v1105_v10, %v1289_v54 }
 0x136   : > { %843 = vpow2.f32 %v447_v53 }
 0x137   : > { %v834_v59 = vpop.eup %833  ;;  %v445_v5 = vmul.f32 1.442695, %v420_v0  ;;  %v451_v63 = vmul.f32 1.442695, %v423_v4 }
 0x138   : > { %v1295_v7 = vpop.xlane.xlu0 %392  ;;  %v1297_v12 = vpop.xlane.xlu1 %398  ;;  %473 = vadd.xlane.f32.xlu0 %v834_v59 }
 0x139   : > { %845 = vpow2.f32 %v445_v5  ;;  %v422_v13 = vsub.f32 %v1122_v15, %v1295_v7  ;;  %v425_v22 = vsub.f32 %v1129_v19, %v1297_v12  ;;  %v836_v9 = vpop.eup %835 }
 0x13a   : > { %847 = vpow2.f32 %v451_v63 }
 0x13b   : > { %v838_v17 = vpop.eup %837  ;;  %v449_v30 = vmul.f32 1.442695, %v422_v13  ;;  %v455_v10 = vmul.f32 1.442695, %v425_v22 }
 0x13c   : > { %v1303_v28 = vpop.xlane.xlu0 %396  ;;  %475 = vadd.xlane.f32.xlu1 %v838_v17  ;;  %v1305_v25 = vpop.xlane.xlu1 %402  ;;  %477 = vadd.xlane.f32.xlu0 %v836_v9 }
 0x13d   : > { %849 = vpow2.f32 %v449_v30  ;;  %v424_v24 = vsub.f32 %v1151_v37, %v1303_v28  ;;  %v427_v15 = vsub.f32 %v1153_v38, %v1305_v25  ;;  %v840_v40 = vpop.eup %839 }
 0x13e   : > { %851 = vpow2.f32 %v455_v10 }
 0x13f   : > { %v842_v23 = vpop.eup %841  ;;  %v453_v50 = vmul.f32 1.442695, %v424_v24  ;;  %v459_v42 = vmul.f32 1.442695, %v427_v15 }
 0x140   : > { %v1311_v26 = vpop.xlane.xlu0 %400  ;;  %479 = vadd.xlane.f32.xlu1 %v842_v23  ;;  %v1313_v52 = vpop.xlane.xlu1 %406  ;;  %481 = vadd.xlane.f32.xlu0 %v840_v40 }
 0x141   : > { %853 = vpow2.f32 %v453_v50  ;;  %v426_v62 = vsub.f32 %v1170_v47, %v1311_v26  ;;  %v429_v37 = vsub.f32 %v1177_v55, %v1313_v52  ;;  %v844_v31 = vpop.eup %843  ;;  %v578_v50 = vsel %vm306_vm13, %v1170_v47, 0.0 }
 0x142   : > { %855 = vpow2.f32 %v459_v42  ;;  %v577_v42 = vsel %vm305_vm10, %v1129_v19, 0.0  ;;  %v582_v47 = vsel %vm310_vm12, %v1209_v11, 0.0  ;;  %v584_v19 = vsel %vm312_vm14, %v1216_v14, 0.0 }
 0x143   : > { %v846_v8 = vpop.eup %845  ;;  %v457_v32 = vmul.f32 1.442695, %v426_v62  ;;  %v463_v34 = vmul.f32 1.442695, %v429_v37  ;;  %v580_v62 = vsel %vm308_vm15, %v1196_v2, 0.0 }
 0x144   : > { %v1319_v41 = vpop.xlane.xlu0 %404  ;;  %483 = vadd.xlane.f32.xlu1 %v846_v8  ;;  %v1321_v45 = vpop.xlane.xlu1 %410  ;;  %485 = vadd.xlane.f32.xlu0 %v844_v31  ;;  %v1388_v31 = vshrl.u32 %v235_v20, 7  ;;  %v1390_v8 = vstv %s642_s24 }
 0x145   : > { %857 = vpow2.f32 %v457_v32  ;;  %v428_v46 = vsub.f32 %v1196_v2, %v1319_v41  ;;  %v431_v43 = vsub.f32 %v1198_v3, %v1321_v45  ;;  %v848_v56 = vpop.eup %847 }
 0x146   : > { %859 = vpow2.f32 %v463_v34 }
 0x147   : > { %v850_v57 = vpop.eup %849  ;;  %v461_v58 = vmul.f32 1.442695, %v428_v46  ;;  %v467_v53 = vmul.f32 1.442695, %v431_v43  ;;  %v664_v43 = vadd.s32 %v1390_v8, %v1388_v31 }
 0x148   : > { %v1327_v0 = vpop.xlane.xlu0 %408  ;;  %487 = vadd.xlane.f32.xlu1 %v850_v57  ;;  %489 = vadd.xlane.f32.xlu0 %v848_v56  ;;  %v852_v59 = vpop.eup %851  ;;  %v645_v56 = vadd.s32 8, %v1388_v31 }
 0x149   : > { %861 = vpow2.f32 %v461_v58  ;;  %v430_v4 = vsub.f32 %v1209_v11, %v1327_v0  ;;  %v588_v38 = vpop.xlane.xlu1 %587  ;;  %vm683_vm3 = vcmp.lt.s32.totalorder %v664_v43, 300 }
 0x14a   : > { %863 = vpow2.f32 %v467_v53 }
 0x14b   : > { %v854_v5 = vpop.eup %853  ;;  %v465_v63 = vmul.f32 1.442695, %v430_v4 }
 0x14c   : > { %v1331_v13 = vpop.xlane.xlu0 %412  ;;  %491 = vadd.xlane.f32.xlu1 %v854_v5  ;;  %493 = vadd.xlane.f32.xlu0 %v852_v59  ;;  %v856_v9 = vpop.eup %855  ;;  %v665_v59 = vadd.s32 %v1390_v8, %v645_v56  ;;  %v646_v5 = vadd.s32 16, %v1388_v31  ;;  %v651_v56 = vadd.s32 56, %v1388_v31 }
 0x14d   : > { %865 = vpow2.f32 %v465_v63  ;;  %v432_v22 = vsub.f32 %v1216_v14, %v1331_v13  ;;  %v1369_v33 = vpop.xlane.xlu1 %591 }
 0x14e   : > { %vm684_vm5 = vcmp.lt.s32.totalorder %v665_v59, 300 }
 0x14f   : > { %v858_v17 = vpop.eup %857  ;;  %v469_v30 = vmul.f32 1.442695, %v432_v22 }
 0x150   : > { %495 = vadd.xlane.f32.xlu1 %v858_v17  ;;  %497 = vadd.xlane.f32.xlu0 %v856_v9  ;;  %v860_v10 = vpop.eup %859  ;;  %v586_v36 = vpop.xlane.xlu0 %585  ;;  %v647_v9 = vadd.s32 24, %v1388_v31 }
 0x151   : > { %867 = vpow2.f32 %v469_v30  ;;  %v1373_v2 = vpop.xlane.xlu1 %595  ;;  %v648_v30 = vadd.s32 32, %v1388_v31 }
 0x153   : > { %v862_v24 = vpop.eup %861 }
 0x154   : > { %499 = vadd.xlane.f32.xlu1 %v862_v24  ;;  %501 = vadd.xlane.f32.xlu0 %v860_v10  ;;  %v864_v15 = vpop.eup %863  ;;  %v1367_v51 = vpop.xlane.xlu0 %589 }
 0x155   : > { %v1377_v11 = vpop.xlane.xlu1 %599 }
 0x157   : > { %v866_v40 = vpop.eup %865 }
 0x158   : > { %503 = vadd.xlane.f32.xlu1 %v866_v40  ;;  %505 = vadd.xlane.f32.xlu0 %v864_v15  ;;  %v1371_v55 = vpop.xlane.xlu0 %593  ;;  %v666_v40 = vadd.s32 %v1390_v8, %v646_v5 }
 0x159   : > { %v1381_v21 = vpop.xlane.xlu1 %603 }
 0x15a   : > { %vm685_vm6 = vcmp.lt.s32.totalorder %v666_v40, 300 }
 0x15b   : > { %v868_v23 = vpop.eup %867 }
 0x15c   : > { %507 = vadd.xlane.f32.xlu1 %v868_v23  ;;  %609 = vadd.xlane.f32.xlu0 %v578_v50  ;;  %v1375_v1 = vpop.xlane.xlu0 %597  ;;  %v649_v23 = vadd.s32 40, %v1388_v31 }
 0x160   : > { %607 = vadd.xlane.f32.xlu1 %v577_v42  ;;  %613 = vadd.xlane.f32.xlu0 %v580_v62  ;;  %v1379_v14 = vpop.xlane.xlu0 %601 }
 0x164   : > { %611 = vadd.xlane.f32.xlu1 %v579_v18  ;;  %617 = vadd.xlane.f32.xlu0 %v582_v47  ;;  %v1383_v48 = vpop.xlane.xlu0 %605  ;;  %v667_v18 = vadd.s32 %v1390_v8, %v647_v9 }
 0x166   : > { %vm686_vm7 = vcmp.lt.s32.totalorder %v667_v18, 300 }
 0x168   : > { %615 = vadd.xlane.f32.xlu1 %v581_v6  ;;  %621 = vadd.xlane.f32.xlu0 %v584_v19 }
 0x16c   : > { %619 = vadd.xlane.f32.xlu1 %v583_v16 }
 0x1c1   : > { %v472_v3 = vpop.xlane.xlu1 %471 }
 0x1c2   : > { %869 = vlog2.f32 %v472_v3 }
 0x1c5   : > { %v474_v37 = vpop.xlane.xlu0 %473 }
 0x1c6   : > { %871 = vlog2.f32 %v474_v37 }
 0x1c9   : > { %v476_v32 = vpop.xlane.xlu1 %475  ;;  %v478_v34 = vpop.xlane.xlu0 %477 }
 0x1ca   : > { %873 = vlog2.f32 %v476_v32  ;;  %v650_v32 = vadd.s32 48, %v1388_v31 }
 0x1cb   : > { %875 = vlog2.f32 %v478_v34 }
 0x1cc   : > { %v870_v46 = vpop.eup %869 }
 0x1cd   : > { %v510_v57 = vmul.f32 0.6931472, %v870_v46  ;;  %v480_v58 = vpop.xlane.xlu1 %479  ;;  %v482_v53 = vpop.xlane.xlu0 %481 }
 0x1ce   : > { %877 = vlog2.f32 %v480_v58 }
 0x1cf   : > { %v547_v20 = vadd.f32 %v510_v57, %v1259_v60  ;;  %879 = vlog2.f32 %v482_v53 }
 0x1d0   : > { %v872_v4 = vpop.eup %871 }
 0x1d1   : > { %v623_v63 = vsub.f32 %v547_v20, %v586_v36  ;;  %v512_v22 = vmul.f32 0.6931472, %v872_v4  ;;  %v484_v17 = vpop.xlane.xlu1 %483  ;;  %v486_v60 = vpop.xlane.xlu0 %485  ;;  %v652_v4 = vadd.s32 64, %v1388_v31 }
 0x1d2   : > { %881 = vlog2.f32 %v484_v17  ;;  %v653_v17 = vadd.s32 72, %v1388_v31 }
 0x1d3   : > { %v702_v10 = vsel %vm683_vm3, %v623_v63, 0.0  ;;  %v548_v24 = vadd.f32 %v512_v22, %v1263_v27  ;;  %883 = vlog2.f32 %v486_v60  ;;  %v668_v27 = vadd.s32 %v1390_v8, %v648_v30 }
 0x1d4   : > { %v874_v15 = vpop.eup %873  ;;  %722 = vst.msk [vmem:[%s1402_s27] sm:$0xff] %vm721_vm4, %v702_v10  ;;  %v670_v63 = vadd.s32 %v1390_v8, %v650_v32  ;;  %v672_v40 = vadd.s32 %v1390_v8, %v652_v4  ;;  %v673_v18 = vadd.s32 %v1390_v8, %v653_v17 }
 0x1d5   : > { %v876_v50 = vpop.eup %875  ;;  %v624_v42 = vsub.f32 %v548_v24, %v588_v38  ;;  %v514_v62 = vmul.f32 0.6931472, %v874_v15  ;;  %v488_v47 = vpop.xlane.xlu1 %487  ;;  %v669_v38 = vadd.s32 %v1390_v8, %v649_v23  ;;  %vm687_vm8 = vcmp.lt.s32.totalorder %v668_v27, 300 }
 0x1d6   : > { %v490_v6 = vpop.xlane.xlu0 %489  ;;  %v516_v19 = vmul.f32 0.6931472, %v876_v50  ;;  %885 = vlog2.f32 %v488_v47  ;;  %vm689_vm10 = vcmp.lt.s32.totalorder %v670_v63, 300  ;;  %vm691_vm12 = vcmp.lt.s32.totalorder %v672_v40, 300 }
 0x1d7   : > { %v703_v16 = vsel %vm684_vm5, %v624_v42, 0.0  ;;  %v549_v36 = vadd.f32 %v514_v62, %v1271_v35  ;;  %887 = vlog2.f32 %v490_v6  ;;  %vm688_vm9 = vcmp.lt.s32.totalorder %v669_v38, 300 }
 0x1d8   : > { %v878_v3 = vpop.eup %877  ;;  %723 = vst.msk [vmem:[%s1402_s27 + $0x8] sm:$0xff] %vm721_vm4, %v703_v16  ;;  %v550_v37 = vadd.f32 %v516_v19, %v1265_v29  ;;  %v654_v42 = vadd.s32 80, %v1388_v31  ;;  %v656_v38 = vadd.s32 96, %v1388_v31  ;;  %vm692_vm13 = vcmp.lt.s32.totalorder %v673_v18, 300 }
 0x1d9   : > { %v880_v34 = vpop.eup %879  ;;  %v625_v46 = vsub.f32 %v549_v36, %v1367_v51  ;;  %v518_v43 = vmul.f32 0.6931472, %v878_v3  ;;  %v492_v35 = vpop.xlane.xlu1 %491 }
 0x1da   : > { %v494_v57 = vpop.xlane.xlu0 %493  ;;  %v626_v58 = vsub.f32 %v550_v37, %v1369_v33  ;;  %v520_v53 = vmul.f32 0.6931472, %v880_v34  ;;  %889 = vlog2.f32 %v492_v35  ;;  %v674_v37 = vadd.s32 %v1390_v8, %v654_v42 }
 0x1db   : > { %v704_v29 = vsel %vm685_vm6, %v625_v46, 0.0  ;;  %v551_v20 = vadd.f32 %v518_v43, %v1279_v44  ;;  %891 = vlog2.f32 %v494_v57  ;;  %v671_v44 = vadd.s32 %v1390_v8, %v651_v56 }
 0x1dc   : > { %v882_v59 = vpop.eup %881  ;;  %724 = vst.msk [vmem:[%s1402_s27 + $0x10] sm:$0xff] %vm721_vm4, %v704_v29  ;;  %v705_v51 = vsel %vm686_vm7, %v626_v58, 0.0  ;;  %v552_v5 = vadd.f32 %v520_v53, %v1273_v39  ;;  %v655_v43 = vadd.s32 88, %v1388_v31  ;;  %v657_v58 = vadd.s32 104, %v1388_v31 }
 0x1dd   : > { %v884_v22 = vpop.eup %883  ;;  %725 = vst.msk [vmem:[%s1402_s27 + $0x18] sm:$0xff] %vm721_vm4, %v705_v51  ;;  %v627_v33 = vsub.f32 %v551_v20, %v1371_v55  ;;  %v522_v9 = vmul.f32 0.6931472, %v882_v59  ;;  %v496_v60 = vpop.xlane.xlu1 %495  ;;  %vm690_vm11 = vcmp.lt.s32.totalorder %v671_v44, 300  ;;  %vm693_vm14 = vcmp.lt.s32.totalorder %v674_v37, 300 }
 0x1de   : > { %v498_v30 = vpop.xlane.xlu0 %497  ;;  %v628_v10 = vsub.f32 %v552_v5, %v1373_v2  ;;  %v524_v24 = vmul.f32 0.6931472, %v884_v22  ;;  %893 = vlog2.f32 %v496_v60  ;;  %v676_v20 = vadd.s32 %v1390_v8, %v656_v38 }
 0x1df   : > { %v706_v39 = vsel %vm687_vm8, %v627_v33, 0.0  ;;  %v553_v15 = vadd.f32 %v522_v9, %v1287_v61  ;;  %895 = vlog2.f32 %v498_v30  ;;  %v675_v5 = vadd.s32 %v1390_v8, %v655_v43 }
 0x1e0   : > { %v886_v55 = vpop.eup %885  ;;  %726 = vst.msk [vmem:[%s1402_s27 + $0x20] sm:$0xff] %vm721_vm4, %v706_v39  ;;  %v707_v23 = vsel %vm688_vm9, %v628_v10, 0.0  ;;  %v554_v50 = vadd.f32 %v524_v24, %v1281_v49  ;;  %v677_v9 = vadd.s32 %v1390_v8, %v657_v58  ;;  %v660_v44 = vadd.s32 128, %v1388_v31 }
 0x1e1   : > { %v888_v2 = vpop.eup %887  ;;  %727 = vst.msk [vmem:[%s1402_s27 + $0x28] sm:$0xff] %vm721_vm4, %v707_v23  ;;  %v629_v62 = vsub.f32 %v553_v15, %v1375_v1  ;;  %v526_v61 = vmul.f32 0.6931472, %v886_v55  ;;  %v500_v47 = vpop.xlane.xlu1 %499  ;;  %vm695_vm15 = vcmp.lt.s32.totalorder %v676_v20, 300  ;;  %vm694_vm0 = vcmp.lt.s32.totalorder %v675_v5, 300 }
 0x1e2   : > { %v502_v6 = vpop.xlane.xlu0 %501  ;;  %v630_v19 = vsub.f32 %v554_v50, %v1377_v11  ;;  %v528_v27 = vmul.f32 0.6931472, %v888_v2  ;;  %897 = vlog2.f32 %v500_v47  ;;  %vm696_vm2 = vcmp.lt.s32.totalorder %v677_v9, 300 }
 0x1e3   : > { %v708_v49 = vsel %vm689_vm10, %v629_v62, 0.0  ;;  %v555_v16 = vadd.f32 %v526_v61, %v1295_v7  ;;  %899 = vlog2.f32 %v502_v6  ;;  %v680_v50 = vadd.s32 %v1390_v8, %v660_v44 }
 0x1e4   : > { %v890_v36 = vpop.eup %889  ;;  %728 = vst.msk [vmem:[%s1402_s27 + $0x30] sm:$0xff] %vm721_vm4, %v708_v49  ;;  %v709_v1 = vsel %vm690_vm11, %v630_v19, 0.0  ;;  %v556_v3 = vadd.f32 %v528_v27, %v1289_v54  ;;  %v658_v54 = vadd.s32 112, %v1388_v31  ;;  %v662_v61 = vadd.s32 144, %v1388_v31 }
 0x1e5   : > { %v892_v32 = vpop.eup %891  ;;  %729 = vst.msk [vmem:[%s1402_s27 + $0x38] sm:$0xff] %vm721_vm4, %v709_v1  ;;  %v631_v11 = vsub.f32 %v555_v16, %v1379_v14  ;;  %v530_v34 = vmul.f32 0.6931472, %v890_v36  ;;  %v504_v7 = vpop.xlane.xlu1 %503  ;;  %v661_v27 = vadd.s32 136, %v1388_v31  ;;  %vm699_vm3 = vcmp.lt.s32.totalorder %v680_v50, 300 }
 0x1e6   : > { %v506_v46 = vpop.xlane.xlu0 %505  ;;  %v632_v56 = vsub.f32 %v556_v3, %v1381_v21  ;;  %901 = vlog2.f32 %v504_v7  ;;  %v532_v29 = vmul.f32 0.6931472, %v892_v32  ;;  %v678_v63 = vadd.s32 %v1390_v8, %v658_v54 }
 0x1e7   : > { %v710_v35 = vsel %vm691_vm12, %v631_v11, 0.0  ;;  %v557_v57 = vadd.f32 %v530_v34, %v1303_v28  ;;  %903 = vlog2.f32 %v506_v46  ;;  %v682_v32 = vadd.s32 %v1390_v8, %v662_v61 }
 0x1e8   : > { %v894_v14 = vpop.eup %893  ;;  %730 = vst.msk [vmem:[%s1402_s27 + $0x40] sm:$0xff] %vm721_vm4, %v710_v35  ;;  %v711_v53 = vsel %vm692_vm13, %v632_v56, 0.0  ;;  %vm697_vm1 = vcmp.lt.s32.totalorder %v678_v63, 300 }
 0x1e9   : > { %v896_v21 = vpop.eup %895  ;;  %731 = vst.msk [vmem:[%s1402_s27 + $0x48] sm:$0xff] %vm721_vm4, %v711_v53  ;;  %v633_v4 = vsub.f32 %v557_v57, %v1383_v48  ;;  %v534_v59 = vmul.f32 0.6931472, %v894_v14  ;;  %v508_v51 = vpop.xlane.xlu1 %507  ;;  %v558_v48 = vadd.f32 %v532_v29, %v1297_v12  ;;  %vm701_vm6 = vcmp.lt.s32.totalorder %v682_v32, 300 }
 0x1ea   : > { %v610_v28 = vpop.xlane.xlu0 %609  ;;  %905 = vlog2.f32 %v508_v51  ;;  %v536_v60 = vmul.f32 0.6931472, %v896_v21 }
 0x1eb   : > { %v712_v22 = vsel %vm693_vm14, %v633_v4, 0.0  ;;  %v559_v33 = vadd.f32 %v534_v59, %v1311_v26  ;;  %v659_v26 = vadd.s32 120, %v1388_v31 }
 0x1ec   : > { %v898_v17 = vpop.eup %897  ;;  %732 = vst.msk [vmem:[%s1402_s27 + $0x50] sm:$0xff] %vm721_vm4, %v712_v22  ;;  %v560_v62 = vadd.f32 %v536_v60, %v1305_v25 }
 0x1ed   : > { %v900_v30 = vpop.eup %899  ;;  %v538_v10 = vmul.f32 0.6931472, %v898_v17  ;;  %v635_v24 = vsub.f32 %v559_v33, %v610_v28  ;;  %v608_v39 = vpop.xlane.xlu1 %607  ;;  %v679_v19 = vadd.s32 %v1390_v8, %v659_v26 }
 0x1ee   : > { %v614_v15 = vpop.xlane.xlu0 %613  ;;  %v634_v40 = vsub.f32 %v558_v48, %v608_v39  ;;  %v540_v12 = vmul.f32 0.6931472, %v900_v30 }
 0x1ef   : > { %v714_v55 = vsel %vm695_vm15, %v635_v24, 0.0  ;;  %v561_v23 = vadd.f32 %v538_v10, %v1319_v41  ;;  %vm698_vm5 = vcmp.lt.s32.totalorder %v679_v19, 300 }
 0x1f0   : > { %v902_v42 = vpop.eup %901  ;;  %734 = vst.msk [vmem:[%s1402_s27 + $0x60] sm:$0xff] %vm721_vm4, %v714_v55  ;;  %v713_v2 = vsel %vm694_vm0, %v634_v40, 0.0  ;;  %v562_v38 = vadd.f32 %v540_v12, %v1313_v52 }
 0x1f1   : > { %v904_v18 = vpop.eup %903  ;;  %v542_v47 = vmul.f32 0.6931472, %v902_v42  ;;  %733 = vst.msk [vmem:[%s1402_s27 + $0x58] sm:$0xff] %vm721_vm4, %v713_v2  ;;  %v637_v6 = vsub.f32 %v561_v23, %v614_v15  ;;  %v612_v41 = vpop.xlane.xlu1 %611 }
 0x1f2   : > { %v636_v49 = vsub.f32 %v560_v62, %v612_v41  ;;  %v618_v16 = vpop.xlane.xlu0 %617  ;;  %v544_v3 = vmul.f32 0.6931472, %v904_v18 }
 0x1f3   : > { %v716_v36 = vsel %vm697_vm1, %v637_v6, 0.0  ;;  %v563_v25 = vadd.f32 %v542_v47, %v1327_v0  ;;  %v681_v0 = vadd.s32 %v1390_v8, %v661_v27 }
 0x1f4   : > { %v906_v1 = vpop.eup %905  ;;  %736 = vst.msk [vmem:[%s1402_s27 + $0x70] sm:$0xff] %vm721_vm4, %v716_v36  ;;  %v715_v37 = vsel %vm696_vm2, %v636_v49, 0.0  ;;  %v564_v54 = vadd.f32 %v544_v3, %v1321_v45 }
 0x1f5   : > { %v546_v31 = vmul.f32 0.6931472, %v906_v1  ;;  %735 = vst.msk [vmem:[%s1402_s27 + $0x68] sm:$0xff] %vm721_vm4, %v715_v37  ;;  %v639_v11 = vsub.f32 %v563_v25, %v618_v16  ;;  %v616_v34 = vpop.xlane.xlu1 %615  ;;  %vm700_vm7 = vcmp.lt.s32.totalorder %v681_v0, 300 }
 0x1f6   : > { %v638_v7 = vsub.f32 %v562_v38, %v616_v34  ;;  %v622_v56 = vpop.xlane.xlu0 %621 }
 0x1f7   : > { %v718_v46 = vsel %vm699_vm3, %v639_v11, 0.0  ;;  %v565_v43 = vadd.f32 %v546_v31, %v1331_v13 }
 0x1f8   : > { %738 = vst.msk [vmem:[%s1402_s27 + $0x80] sm:$0xff] %vm721_vm4, %v718_v46  ;;  %v717_v52 = vsel %vm698_vm5, %v638_v7, 0.0 }
 0x1f9   : > { %737 = vst.msk [vmem:[%s1402_s27 + $0x78] sm:$0xff] %vm721_vm4, %v717_v52  ;;  %v641_v35 = vsub.f32 %v565_v43, %v622_v56  ;;  %v620_v57 = vpop.xlane.xlu1 %619 }
 0x1fa   : > { %v640_v58 = vsub.f32 %v564_v54, %v620_v57 }
 0x1fb   : > { %v720_v14 = vsel %vm701_vm6, %v641_v35, 0.0 }
 0x1fc   : > { %740 = vst.msk [vmem:[%s1402_s27 + $0x90] sm:$0xff] %vm721_vm4, %v720_v14  ;;  %v719_v8 = vsel %vm700_vm7, %v640_v58, 0.0 }
 0x1fd   : > { %739 = vst.msk [vmem:[%s1402_s27 + $0x88] sm:$0xff] %vm721_vm4, %v719_v8 }
 0x1fe PF: > { %s13_s12 = sadd.s32 1, %s913_s12  }
 0x1ff   : > { %p10_p4 = scmp.ge.s32.totalorder %s13_s12, 4  }
 0x201   :  { %12 = sbr.rel (!%p10_p4) target bundleno = 1 (0x1), region = 65 }

</bundles_post_ra>
